<compile_context>
chip_gen: v7x
topology: tpu7x:2x2x1
jax: 0.10.0
libtpu: 0.0.40
codegen_flags: <defaults>
</compile_context>

<pallas_src>
import math

import jax
import jax.numpy as jnp
from jax.experimental import pallas as pl
from jax.experimental.pallas import tpu as pltpu

_LANE = 128      # lane width (hidden dim padding target)
_SUBLANE = 8     # f32 sublane; batch tiles are kept multiples of this


def _round_up(n, m):
    return ((n + m - 1) // m) * m


def _mlp_kernel(x_ref,
                w0_ref, b0_ref,
                w1_ref, b1_ref,
                w2_ref, b2_ref,
                w3_ref, b3_ref,
                w4_ref, b4_ref,
                w5_ref, b5_ref,
                o_ref):
    """One batch tile of the 6-layer MLP; all weights resident in VMEM.

    MXU operands are bf16, accumulation / bias add stay f32; inter-layer
    activations are carried in bf16 to halve live vreg pressure.
    """
    h = x_ref[...].astype(jnp.bfloat16)                                  # (M, n_in)

    # inp — no ReLU after this layer.
    h = jnp.dot(h, w0_ref[...], preferred_element_type=jnp.float32) + b0_ref[...]
    h = h.astype(jnp.bfloat16)

    # hidden1..hidden3 — ReLU after each (Python loop unrolls at trace time).
    for w_ref, b_ref in ((w1_ref, b1_ref), (w2_ref, b2_ref), (w3_ref, b3_ref)):
        h = jnp.dot(h, w_ref[...], preferred_element_type=jnp.float32) + b_ref[...]
        h = jnp.maximum(h, 0.0).astype(jnp.bfloat16)

    # hidden4 — no ReLU.
    h = jnp.dot(h, w4_ref[...], preferred_element_type=jnp.float32) + b4_ref[...]
    h = h.astype(jnp.bfloat16)

    # out — natural (unpadded) output width: HBM writeback only touches the
    # real N_output columns.
    y = jnp.dot(h, w5_ref[...], preferred_element_type=jnp.float32) + b5_ref[...]
    o_ref[...] = y.astype(o_ref.dtype)


def _prepare_params(params):
    """Transpose torch-layout weights to (in, out) and zero-pad hidden dims to 128 lanes.

    params: 6 (W, b) pairs, W in torch layout (out, in), b (out,).
    Returns (flat_param_list, n_in, n_out, hid_padded).
    """
    (W0, b0), (W1, b1), (W2, b2), (W3, b3), (W4, b4), (W5, b5) = [
        (jnp.asarray(W, jnp.float32), jnp.asarray(b, jnp.float32)) for (W, b) in params
    ]
    n_in = W0.shape[1]
    n_hid = W0.shape[0]
    n_out = W5.shape[0]
    hid_p = _round_up(n_hid, _LANE)

    def wt(W, rows_p, cols_p):
        Wt = W.T                     # (in, out)
        r, c = Wt.shape
        return jnp.pad(Wt, ((0, rows_p - r), (0, cols_p - c))).astype(jnp.bfloat16)

    def bias(b, cols_p):
        return jnp.pad(b, (0, cols_p - b.shape[0]))[None, :].astype(jnp.float32)

    # Zero padding is self-consistent: padded hidden columns stay exactly 0
    # through every layer (zero weight cols/rows + zero bias + ReLU).
    flat = [
        wt(W0, n_in, hid_p),  bias(b0, hid_p),
        wt(W1, hid_p, hid_p), bias(b1, hid_p),
        wt(W2, hid_p, hid_p), bias(b2, hid_p),
        wt(W3, hid_p, hid_p), bias(b3, hid_p),
        wt(W4, hid_p, hid_p), bias(b4, hid_p),
        wt(W5, hid_p, n_out), bias(b5, n_out),
    ]
    return flat, n_in, n_out, hid_p


def net_forward(x, params, *, block_batch=None):
    """Run the MLP forward pass with a Pallas TPU kernel.

    x:      (B, N_input) float32
    params: list of 6 (W, b) pairs, W in torch layout (out, in), b (out,)
    Returns (B, N_output) float32.
    """
    x = jnp.asarray(x, jnp.float32)
    B, n_in = x.shape

    flat_params, n_in_w, n_out, hid_p = _prepare_params(params)
    assert n_in == n_in_w, "input feature dim mismatch between x and params"

    if block_batch is None:
        # Large tiles amortize the ~0.35us/step pipeline overhead; for batches
        # big enough for two >=256-row tiles, keep the grid length >= 2 so the
        # ("parallel",) axis can be split across v7x's two TensorCores.
        if B >= 512:
            block_batch = min(1024, _round_up(-(-B // 2), _SUBLANE))
        else:
            block_batch = min(1024, _round_up(B, _SUBLANE))
    block_batch = max(_SUBLANE, _round_up(int(block_batch), _SUBLANE))

    grid = (pl.cdiv(B, block_batch),)   # partial last block handled by Pallas;
                                        # rows are independent so the padded
                                        # tail rows are never reduced over.

    in_specs = [pl.BlockSpec((block_batch, n_in), lambda i: (i, 0))]
    # Grid-invariant weights/biases: plain constant-index full-array blocks
    # (fetched once, kept VMEM-resident by the pipeline).
    in_specs += [pl.BlockSpec(p.shape, lambda i: (0, 0)) for p in flat_params]
    out_specs = pl.BlockSpec((block_batch, n_out), lambda i: (i, 0))

    # VMEM budget: double-buffered weights/biases + pipelined x/out tiles
    # (lane-padded in VMEM) + f32 activation working set, with 2x headroom.
    def lane(n):
        return _round_up(n, _LANE)

    weight_bytes = 2 * sum(int(p.size) * p.dtype.itemsize for p in flat_params)
    io_bytes = 2 * block_batch * (lane(n_in) + lane(n_out)) * 4
    act_bytes = 4 * block_batch * hid_p * 4
    needed = weight_bytes + io_bytes + act_bytes
    vmem_limit = int(min(2 * needed + (4 << 20), 64 << 20))
    # TODO(synk): for hidden sizes where resident weights no longer fit VMEM
    # (H >~ 2k bf16 on v7x), stream weights layer-by-layer with
    # pltpu.emit_pipeline instead of keeping them all resident.

    return pl.pallas_call(
        _mlp_kernel,
        out_shape=jax.ShapeDtypeStruct((B, n_out), jnp.float32),
        grid_spec=pltpu.PrefetchScalarGridSpec(
            num_scalar_prefetch=0,
            grid=grid,
            in_specs=in_specs,
            out_specs=out_specs,
        ),
        compiler_params=pltpu.CompilerParams(
            dimension_semantics=("parallel",),
            vmem_limit_bytes=vmem_limit,
        ),
    )(x, *flat_params)


def _init_linear(key, n_out, n_in):
    """Deterministic init mimicking torch.nn.Linear default (uniform +-1/sqrt(fan_in))."""
    kw, kb = jax.random.split(key)
    bound = 1.0 / math.sqrt(n_in)
    W = jax.random.uniform(kw, (n_out, n_in), jnp.float32, -bound, bound)
    b = jax.random.uniform(kb, (n_out,), jnp.float32, -bound, bound)
    return W, b


def _reference_forward(x, params):
    """Pure-JAX f32 reference matching the PyTorch forward exactly."""
    (W0, b0), (W1, b1), (W2, b2), (W3, b3), (W4, b4), (W5, b5) = params
    h = x @ W0.T + b0
    h = jnp.maximum(h @ W1.T + b1, 0.0)
    h = jnp.maximum(h @ W2.T + b2, 0.0)
    h = jnp.maximum(h @ W3.T + b3, 0.0)
    h = h @ W4.T + b4
    return h @ W5.T + b5


if __name__ == "__main__":
    # Small, forward-implied shapes: batch of flat feature vectors.
    N_input, N_hidden, N_output = 16, 32, 4
    batch = 8

    root = jax.random.PRNGKey(0)
    keys = jax.random.split(root, 7)

    params = [
        _init_linear(keys[0], N_hidden, N_input),    # inp
        _init_linear(keys[1], N_hidden, N_hidden),   # hidden1
        _init_linear(keys[2], N_hidden, N_hidden),   # hidden2
        _init_linear(keys[3], N_hidden, N_hidden),   # hidden3
        _init_linear(keys[4], N_hidden, N_hidden),   # hidden4
        _init_linear(keys[5], N_output, N_hidden),   # out
    ]

    x = jax.random.normal(keys[6], (batch, N_input), jnp.float32)

    y = jax.block_until_ready(net_forward(x, params))
    y_ref = _reference_forward(x, params)

    assert y.shape == (batch, N_output)
    # bf16 MXU operands + bf16 inter-layer activations vs the pure-f32
    # reference; f32 accumulation keeps the error well within this tolerance.
    max_err = float(jnp.max(jnp.abs(y - y_ref)))
    assert jnp.allclose(y, y_ref, atol=5e-2, rtol=5e-2), (
        f"Pallas output mismatch vs reference (max abs err {max_err})")

    print("KERNEL_OK")
</pallas_src>

<mosaic_0001>
module attributes {stable_mosaic.version = 11 : i64} {
  func.func @_mlp_kernel(%arg0: i32, %arg1: memref<8x16xf32, #tpu.memory_space<vmem>>, %arg2: memref<16x128xbf16, #tpu.memory_space<vmem>>, %arg3: memref<1x128xf32, #tpu.memory_space<vmem>>, %arg4: memref<128x128xbf16, #tpu.memory_space<vmem>>, %arg5: memref<1x128xf32, #tpu.memory_space<vmem>>, %arg6: memref<128x128xbf16, #tpu.memory_space<vmem>>, %arg7: memref<1x128xf32, #tpu.memory_space<vmem>>, %arg8: memref<128x128xbf16, #tpu.memory_space<vmem>>, %arg9: memref<1x128xf32, #tpu.memory_space<vmem>>, %arg10: memref<128x128xbf16, #tpu.memory_space<vmem>>, %arg11: memref<1x128xf32, #tpu.memory_space<vmem>>, %arg12: memref<128x4xbf16, #tpu.memory_space<vmem>>, %arg13: memref<1x4xf32, #tpu.memory_space<vmem>>, %arg14: memref<8x4xf32, #tpu.memory_space<vmem>>) attributes {dimension_semantics = [#tpu.dimension_semantics<parallel>], iteration_bounds = array<i64: 1>, scalar_prefetch = 0 : i64, scratch_operands = 0 : i64, tpu.core_type = #tpu.core_type<tc>, window_params = [{transform_indices = @transform_0, window_bounds = array<i64: 8, 16>}, {pipeline_mode = #tpu.pipeline_mode<synchronous>, transform_indices = @transform_1, window_bounds = array<i64: 16, 128>}, {pipeline_mode = #tpu.pipeline_mode<synchronous>, transform_indices = @transform_2, window_bounds = array<i64: 1, 128>}, {pipeline_mode = #tpu.pipeline_mode<synchronous>, transform_indices = @transform_3, window_bounds = array<i64: 128, 128>}, {pipeline_mode = #tpu.pipeline_mode<synchronous>, transform_indices = @transform_4, window_bounds = array<i64: 1, 128>}, {pipeline_mode = #tpu.pipeline_mode<synchronous>, transform_indices = @transform_5, window_bounds = array<i64: 128, 128>}, {pipeline_mode = #tpu.pipeline_mode<synchronous>, transform_indices = @transform_6, window_bounds = array<i64: 1, 128>}, {pipeline_mode = #tpu.pipeline_mode<synchronous>, transform_indices = @transform_7, window_bounds = array<i64: 128, 128>}, {pipeline_mode = #tpu.pipeline_mode<synchronous>, transform_indices = @transform_8, window_bounds = array<i64: 1, 128>}, {pipeline_mode = #tpu.pipeline_mode<synchronous>, transform_indices = @transform_9, window_bounds = array<i64: 128, 128>}, {pipeline_mode = #tpu.pipeline_mode<synchronous>, transform_indices = @transform_10, window_bounds = array<i64: 1, 128>}, {pipeline_mode = #tpu.pipeline_mode<synchronous>, transform_indices = @transform_11, window_bounds = array<i64: 128, 4>}, {pipeline_mode = #tpu.pipeline_mode<synchronous>, transform_indices = @transform_12, window_bounds = array<i64: 1, 4>}, {transform_indices = @transform_13, window_bounds = array<i64: 8, 4>}]} {
    %c0 = arith.constant 0 : index
    %c0_0 = arith.constant 0 : index
    %0 = vector.load %arg1[%c0, %c0_0] : memref<8x16xf32, #tpu.memory_space<vmem>>, vector<8x16xf32>
    %1 = arith.truncf %0 : vector<8x16xf32> to vector<8x16xbf16>
    %c0_1 = arith.constant 0 : index
    %c0_2 = arith.constant 0 : index
    %2 = vector.load %arg2[%c0_1, %c0_2] : memref<16x128xbf16, #tpu.memory_space<vmem>>, vector<16x128xbf16>
    %cst = arith.constant dense<0.000000e+00> : vector<8x128xf32>
    %3 = tpu.matmul %1, %2, %cst {dimension_numbers = #tpu.dot_dimension_numbers<[1], [0], [0], [1], [0, 0, 1, 1], [], []>} : vector<8x16xbf16>, vector<16x128xbf16>, vector<8x128xf32> -> vector<8x128xf32>
    %c0_3 = arith.constant 0 : index
    %c0_4 = arith.constant 0 : index
    %4 = vector.load %arg3[%c0_3, %c0_4] : memref<1x128xf32, #tpu.memory_space<vmem>>, vector<1x128xf32>
    %5 = vector.broadcast %4 : vector<1x128xf32> to vector<8x128xf32>
    %6 = arith.addf %3, %5 : vector<8x128xf32>
    %7 = arith.truncf %6 : vector<8x128xf32> to vector<8x128xbf16>
    %c0_5 = arith.constant 0 : index
    %c0_6 = arith.constant 0 : index
    %8 = vector.load %arg4[%c0_5, %c0_6] : memref<128x128xbf16, #tpu.memory_space<vmem>>, vector<128x128xbf16>
    %cst_7 = arith.constant dense<0.000000e+00> : vector<8x128xf32>
    %9 = tpu.matmul %7, %8, %cst_7 {dimension_numbers = #tpu.dot_dimension_numbers<[1], [0], [0], [1], [0, 0, 1, 1], [], []>} : vector<8x128xbf16>, vector<128x128xbf16>, vector<8x128xf32> -> vector<8x128xf32>
    %c0_8 = arith.constant 0 : index
    %c0_9 = arith.constant 0 : index
    %10 = vector.load %arg5[%c0_8, %c0_9] : memref<1x128xf32, #tpu.memory_space<vmem>>, vector<1x128xf32>
    %11 = vector.broadcast %10 : vector<1x128xf32> to vector<8x128xf32>
    %12 = arith.addf %9, %11 : vector<8x128xf32>
    %cst_10 = arith.constant 0.000000e+00 : f32
    %13 = vector.broadcast %cst_10 : f32 to vector<8x128xf32>
    %14 = arith.maximumf %12, %13 : vector<8x128xf32>
    %15 = arith.truncf %14 : vector<8x128xf32> to vector<8x128xbf16>
    %c0_11 = arith.constant 0 : index
    %c0_12 = arith.constant 0 : index
    %16 = vector.load %arg6[%c0_11, %c0_12] : memref<128x128xbf16, #tpu.memory_space<vmem>>, vector<128x128xbf16>
    %cst_13 = arith.constant dense<0.000000e+00> : vector<8x128xf32>
    %17 = tpu.matmul %15, %16, %cst_13 {dimension_numbers = #tpu.dot_dimension_numbers<[1], [0], [0], [1], [0, 0, 1, 1], [], []>} : vector<8x128xbf16>, vector<128x128xbf16>, vector<8x128xf32> -> vector<8x128xf32>
    %c0_14 = arith.constant 0 : index
    %c0_15 = arith.constant 0 : index
    %18 = vector.load %arg7[%c0_14, %c0_15] : memref<1x128xf32, #tpu.memory_space<vmem>>, vector<1x128xf32>
    %19 = vector.broadcast %18 : vector<1x128xf32> to vector<8x128xf32>
    %20 = arith.addf %17, %19 : vector<8x128xf32>
    %cst_16 = arith.constant 0.000000e+00 : f32
    %21 = vector.broadcast %cst_16 : f32 to vector<8x128xf32>
    %22 = arith.maximumf %20, %21 : vector<8x128xf32>
    %23 = arith.truncf %22 : vector<8x128xf32> to vector<8x128xbf16>
    %c0_17 = arith.constant 0 : index
    %c0_18 = arith.constant 0 : index
    %24 = vector.load %arg8[%c0_17, %c0_18] : memref<128x128xbf16, #tpu.memory_space<vmem>>, vector<128x128xbf16>
    %cst_19 = arith.constant dense<0.000000e+00> : vector<8x128xf32>
    %25 = tpu.matmul %23, %24, %cst_19 {dimension_numbers = #tpu.dot_dimension_numbers<[1], [0], [0], [1], [0, 0, 1, 1], [], []>} : vector<8x128xbf16>, vector<128x128xbf16>, vector<8x128xf32> -> vector<8x128xf32>
    %c0_20 = arith.constant 0 : index
    %c0_21 = arith.constant 0 : index
    %26 = vector.load %arg9[%c0_20, %c0_21] : memref<1x128xf32, #tpu.memory_space<vmem>>, vector<1x128xf32>
    %27 = vector.broadcast %26 : vector<1x128xf32> to vector<8x128xf32>
    %28 = arith.addf %25, %27 : vector<8x128xf32>
    %cst_22 = arith.constant 0.000000e+00 : f32
    %29 = vector.broadcast %cst_22 : f32 to vector<8x128xf32>
    %30 = arith.maximumf %28, %29 : vector<8x128xf32>
    %31 = arith.truncf %30 : vector<8x128xf32> to vector<8x128xbf16>
    %c0_23 = arith.constant 0 : index
    %c0_24 = arith.constant 0 : index
    %32 = vector.load %arg10[%c0_23, %c0_24] : memref<128x128xbf16, #tpu.memory_space<vmem>>, vector<128x128xbf16>
    %cst_25 = arith.constant dense<0.000000e+00> : vector<8x128xf32>
    %33 = tpu.matmul %31, %32, %cst_25 {dimension_numbers = #tpu.dot_dimension_numbers<[1], [0], [0], [1], [0, 0, 1, 1], [], []>} : vector<8x128xbf16>, vector<128x128xbf16>, vector<8x128xf32> -> vector<8x128xf32>
    %c0_26 = arith.constant 0 : index
    %c0_27 = arith.constant 0 : index
    %34 = vector.load %arg11[%c0_26, %c0_27] : memref<1x128xf32, #tpu.memory_space<vmem>>, vector<1x128xf32>
    %35 = vector.broadcast %34 : vector<1x128xf32> to vector<8x128xf32>
    %36 = arith.addf %33, %35 : vector<8x128xf32>
    %37 = arith.truncf %36 : vector<8x128xf32> to vector<8x128xbf16>
    %c0_28 = arith.constant 0 : index
    %c0_29 = arith.constant 0 : index
    %38 = vector.load %arg12[%c0_28, %c0_29] : memref<128x4xbf16, #tpu.memory_space<vmem>>, vector<128x4xbf16>
    %cst_30 = arith.constant dense<0.000000e+00> : vector<8x4xf32>
    %39 = tpu.matmul %37, %38, %cst_30 {dimension_numbers = #tpu.dot_dimension_numbers<[1], [0], [0], [1], [0, 0, 1, 1], [], []>} : vector<8x128xbf16>, vector<128x4xbf16>, vector<8x4xf32> -> vector<8x4xf32>
    %c0_31 = arith.constant 0 : index
    %c0_32 = arith.constant 0 : index
    %40 = vector.load %arg13[%c0_31, %c0_32] : memref<1x4xf32, #tpu.memory_space<vmem>>, vector<1x4xf32>
    %41 = vector.broadcast %40 : vector<1x4xf32> to vector<8x4xf32>
    %42 = arith.addf %39, %41 : vector<8x4xf32>
    %c0_33 = arith.constant 0 : index
    %c0_34 = arith.constant 0 : index
    %43 = vector.load %arg14[%c0_33, %c0_34] : memref<8x4xf32, #tpu.memory_space<vmem>>, vector<8x4xf32>
    tpu.vector_store %arg14[%c0_33, %c0_34], %42 {strides = array<i32>} : memref<8x4xf32, #tpu.memory_space<vmem>>, vector<8x4xf32>,
    return
  }
  func.func @transform_0(%arg0: i32) -> (i32, i32) {
    %c0_i32 = arith.constant 0 : i32
    %c0_i32_0 = arith.constant 0 : i32
    return %arg0, %c0_i32 : i32, i32
  }
  func.func @transform_1(%arg0: i32) -> (i32, i32) {
    %c0_i32 = arith.constant 0 : i32
    %c0_i32_0 = arith.constant 0 : i32
    %c0_i32_1 = arith.constant 0 : i32
    return %c0_i32, %c0_i32_0 : i32, i32
  }
  func.func @transform_2(%arg0: i32) -> (i32, i32) {
    %c0_i32 = arith.constant 0 : i32
    %c0_i32_0 = arith.constant 0 : i32
    %c0_i32_1 = arith.constant 0 : i32
    return %c0_i32, %c0_i32_0 : i32, i32
  }
  func.func @transform_3(%arg0: i32) -> (i32, i32) {
    %c0_i32 = arith.constant 0 : i32
    %c0_i32_0 = arith.constant 0 : i32
    %c0_i32_1 = arith.constant 0 : i32
    return %c0_i32, %c0_i32_0 : i32, i32
  }
  func.func @transform_4(%arg0: i32) -> (i32, i32) {
    %c0_i32 = arith.constant 0 : i32
    %c0_i32_0 = arith.constant 0 : i32
    %c0_i32_1 = arith.constant 0 : i32
    return %c0_i32, %c0_i32_0 : i32, i32
  }
  func.func @transform_5(%arg0: i32) -> (i32, i32) {
    %c0_i32 = arith.constant 0 : i32
    %c0_i32_0 = arith.constant 0 : i32
    %c0_i32_1 = arith.constant 0 : i32
    return %c0_i32, %c0_i32_0 : i32, i32
  }
  func.func @transform_6(%arg0: i32) -> (i32, i32) {
    %c0_i32 = arith.constant 0 : i32
    %c0_i32_0 = arith.constant 0 : i32
    %c0_i32_1 = arith.constant 0 : i32
    return %c0_i32, %c0_i32_0 : i32, i32
  }
  func.func @transform_7(%arg0: i32) -> (i32, i32) {
    %c0_i32 = arith.constant 0 : i32
    %c0_i32_0 = arith.constant 0 : i32
    %c0_i32_1 = arith.constant 0 : i32
    return %c0_i32, %c0_i32_0 : i32, i32
  }
  func.func @transform_8(%arg0: i32) -> (i32, i32) {
    %c0_i32 = arith.constant 0 : i32
    %c0_i32_0 = arith.constant 0 : i32
    %c0_i32_1 = arith.constant 0 : i32
    return %c0_i32, %c0_i32_0 : i32, i32
  }
  func.func @transform_9(%arg0: i32) -> (i32, i32) {
    %c0_i32 = arith.constant 0 : i32
    %c0_i32_0 = arith.constant 0 : i32
    %c0_i32_1 = arith.constant 0 : i32
    return %c0_i32, %c0_i32_0 : i32, i32
  }
  func.func @transform_10(%arg0: i32) -> (i32, i32) {
    %c0_i32 = arith.constant 0 : i32
    %c0_i32_0 = arith.constant 0 : i32
    %c0_i32_1 = arith.constant 0 : i32
    return %c0_i32, %c0_i32_0 : i32, i32
  }
  func.func @transform_11(%arg0: i32) -> (i32, i32) {
    %c0_i32 = arith.constant 0 : i32
    %c0_i32_0 = arith.constant 0 : i32
    %c0_i32_1 = arith.constant 0 : i32
    return %c0_i32, %c0_i32_0 : i32, i32
  }
  func.func @transform_12(%arg0: i32) -> (i32, i32) {
    %c0_i32 = arith.constant 0 : i32
    %c0_i32_0 = arith.constant 0 : i32
    %c0_i32_1 = arith.constant 0 : i32
    return %c0_i32, %c0_i32_0 : i32, i32
  }
  func.func @transform_13(%arg0: i32) -> (i32, i32) {
    %c0_i32 = arith.constant 0 : i32
    %c0_i32_0 = arith.constant 0 : i32
    return %arg0, %c0_i32 : i32, i32
  }
}

</mosaic_0001>

<bundles_post_ra>
// kernel: tpu_custom_call.1
= control target key start
LH: loop header
LB: loop body
LE: loop exit
PB: predicated region body
PF: predicated region fallthrough
CT: control target
= control target key end

     0   :  { %18 = vsyncpa [#allocation3], 0  ;;  %s1354_s0 = inlined_call_operand.vmem [shape: f32[8,16], index: 0, kind: input, shape index: {}]   ;;  %s1355_s1 = inlined_call_operand.hbm [shape: bf16[16,128], index: 1, kind: input, shape index: {}]   ;;  %s1356_s2 = inlined_call_operand.vmem [shape: f32[1,128], index: 2, kind: input, shape index: {}]   ;;  %s1357_s3 = inlined_call_operand.vmem [shape: bf16[128,128], index: 3, kind: input, shape index: {}]   ;;  %s1358_s4 = inlined_call_operand.vmem [shape: f32[1,128], index: 4, kind: input, shape index: {}]   ;;  %s1359_s5 = inlined_call_operand.hbm [shape: bf16[128,128], index: 5, kind: input, shape index: {}]   ;;  %s1360_s6 = inlined_call_operand.vmem [shape: f32[1,128], index: 6, kind: input, shape index: {}]   ;;  %s1361_s7 = inlined_call_operand.hbm [shape: bf16[128,128], index: 7, kind: input, shape index: {}]   ;;  %s1362_s8 = inlined_call_operand.vmem [shape: f32[1,128], index: 8, kind: input, shape index: {}]   ;;  %s1363_s9 = inlined_call_operand.hbm [shape: bf16[128,128], index: 9, kind: input, shape index: {}]   ;;  %s1364_s10 = inlined_call_operand.vmem [shape: f32[1,128], index: 10, kind: input, shape index: {}]   ;;  %s1365_s11 = inlined_call_operand.vmem [shape: bf16[128,4], index: 11, kind: input, shape index: {}]   ;;  %s1366_s12 = inlined_call_operand.vmem [shape: f32[1,4], index: 12, kind: input, shape index: {}]   ;;  %s1367_s13 = inlined_call_operand.vmem [shape: f32[8,4], index: 13, kind: output, shape index: {}]  }
   0x1   :  { %19 = vsyncpa [#allocation5], 0 }
   0x2   :  { %20 = vsyncpa [#allocation8], 0  ;;  %s1077_s25 = smov [#allocation4]   ;;  %s1078_s27 = smov [#allocation2]  }
   0x3   :  { %s46_s26 = sshll.u32 %s1077_s25, 4  ;;  %s28_s28 = sshll.u32 %s1078_s27, 4  ;;  %s47_s26 = int_to_ptr.vmem [resolvable:$true] %s46_s26  ;;  %s1155_s28 = int_to_ptr.vmem [resolvable:$true] %s28_s28 }
   0x4   :  { %s983_s14 = scalar_lea.hbm %s1359_s5, 1024 }
   0x5   :  { %p984_p0 = scmp.ne.s32.totalorder %s1359_s5, %s983_s14  ;;  %p987_p1 = scmp.lt.u32.totalorder %s983_s14, %s1359_s5 }
   0x7   :  { %p989_p2 = pnand %p987_p1, %p984_p0 }
   0x9   :  { %992 = shalt.err (!%p989_p2)
}
   0xa   :  { %s993_s19 = scalar_lea.vmem %s47_s26, 1024  ;;  %p998_p4 = scmp.lt.s32.totalorder %s47_s26, %s47_s26 }
   0xb   :  { %p994_p3 = scmp.ne.s32.totalorder %s47_s26, %s993_s19  ;;  %p999_p5 = scmp.lt.s32.totalorder %s993_s19, %s993_s19 }
   0xd   :  { %p1000_p6 = por %p999_p5, %p998_p4 }
   0xf   :  { %p1001_p7 = pnand %p1000_p6, %p994_p3 }
  0x11   :  { %1004 = shalt.err (!%p1001_p7)
}
  0x12   :  { %s1079_s20 = smov 64   ;;  %s1080_s21 = smov 4  }
  0x13   :  { %52 = dma.hbm_to_vmem [thread:$0]  %s1359_s5, 1024, %s47_s26, [#allocation5], %s1079_s20, %s1079_s20, %s1080_s21  }
  0x14   :  { %s1005_s27 = scalar_lea.hbm %s1355_s1, 128 }
  0x15   :  { %p1006_p8 = scmp.ne.s32.totalorder %s1355_s1, %s1005_s27  ;;  %p1009_p9 = scmp.lt.u32.totalorder %s1005_s27, %s1355_s1 }
  0x17   :  { %p1011_p10 = pnand %p1009_p9, %p1006_p8 }
  0x19   :  { %1014 = shalt.err (!%p1011_p10)
}
  0x1a   :  { %s1015_s16 = scalar_lea.vmem %s1155_s28, 128  ;;  %p1020_p12 = scmp.lt.s32.totalorder %s1155_s28, %s1155_s28 }
  0x1b   :  { %p1016_p11 = scmp.ne.s32.totalorder %s1155_s28, %s1015_s16  ;;  %p1021_p13 = scmp.lt.s32.totalorder %s1015_s16, %s1015_s16 }
  0x1d   :  { %p1022_p0 = por %p1021_p13, %p1020_p12 }
  0x1f   :  { %p1023_p1 = pnand %p1022_p0, %p1016_p11 }
  0x21   :  { %1026 = shalt.err (!%p1023_p1)
}
  0x22   :  { %34 = dma.hbm_to_vmem [thread:$0]  %s1355_s1, 128, %s1155_s28, [#allocation3], %s1079_s20, %s1079_s20, %s1080_s21  }
  0x23   :  { %s1081_s17 = smov [#allocation6]   ;;  %s1082_s19 = smov [#allocation7]  }
  0x24   :  { %s60_s18 = sshll.u32 %s1081_s17, 4  ;;  %s74_s22 = sshll.u32 %s1082_s19, 4  ;;  %s61_s18 = int_to_ptr.vmem [resolvable:$true] %s60_s18  ;;  %s1192_s22 = int_to_ptr.vmem [resolvable:$true] %s74_s22 }
  0x25   :  { %s1027_s25 = scalar_lea.hbm %s1361_s7, 1024 }
  0x26   :  { %p1028_p2 = scmp.ne.s32.totalorder %s1361_s7, %s1027_s25  ;;  %p1031_p3 = scmp.lt.u32.totalorder %s1027_s25, %s1361_s7 }
  0x28   :  { %p1033_p4 = pnand %p1031_p3, %p1028_p2 }
  0x2a   :  { %1036 = shalt.err (!%p1033_p4)
}
  0x2b   :  { %s1037_s1 = scalar_lea.vmem %s61_s18, 1024  ;;  %p1042_p6 = scmp.lt.s32.totalorder %s61_s18, %s61_s18 }
  0x2c   :  { %p1038_p5 = scmp.ne.s32.totalorder %s61_s18, %s1037_s1  ;;  %p1043_p7 = scmp.lt.s32.totalorder %s1037_s1, %s1037_s1 }
  0x2e   :  { %p1044_p8 = por %p1043_p7, %p1042_p6 }
  0x30   :  { %p1045_p9 = pnand %p1044_p8, %p1038_p5 }
  0x32   :  { %1048 = shalt.err (!%p1045_p9)
}
  0x33   :  { %66 = dma.hbm_to_vmem [thread:$0]  %s1361_s7, 1024, %s61_s18, [#allocation5], %s1079_s20, %s1079_s20, %s1080_s21  }
  0x34   :  { %s1049_s26 = scalar_lea.hbm %s1363_s9, 1024 }
  0x35   :  { %p1050_p10 = scmp.ne.s32.totalorder %s1363_s9, %s1049_s26  ;;  %p1053_p11 = scmp.lt.u32.totalorder %s1049_s26, %s1363_s9 }
  0x37   :  { %p1055_p12 = pnand %p1053_p11, %p1050_p10 }
  0x39   :  { %1058 = shalt.err (!%p1055_p12)
}
  0x3a   :  { %s1059_s25 = scalar_lea.vmem %s1192_s22, 1024  ;;  %p1064_p0 = scmp.lt.s32.totalorder %s1192_s22, %s1192_s22 }
  0x3b   :  { %p1060_p13 = scmp.ne.s32.totalorder %s1192_s22, %s1059_s25  ;;  %p1065_p1 = scmp.lt.s32.totalorder %s1059_s25, %s1059_s25 }
  0x3d   :  { %p1066_p2 = por %p1065_p1, %p1064_p0 }
  0x3f   :  { %p1067_p3 = pnand %p1066_p2, %p1060_p13 }
  0x41   :  { %1070 = shalt.err (!%p1067_p3)
}
  0x42   :  { %80 = dma.hbm_to_vmem [thread:$0]  %s1363_s9, 1024, %s1192_s22, [#allocation8], %s1079_s20, %s1079_s20, %s1080_s21  }
  0x43   :  { %1071 = dma.done.wait [#allocation3], 128  }
  0x44   :  { %1072 = vsyncadd [#allocation3], 4294967168 }
  0x45   :  { %1073 = dma.done.wait [#allocation5], 2048  }
  0x46   :  { %1074 = vsyncadd [#allocation5], 4294965248 }
  0x47   :  { %1075 = dma.done.wait [#allocation8], 1024  }
  0x48   :  { %1076 = vsyncadd [#allocation8], 4294966272  ;;  %v1083_v0 = vmov 0.0   ;;  %vm1084_vm0 = vmmov 0   ;;  %v942_v1 = vld [vmem:[#allocation2] sm:$0xff]   ;;  %vm117_vm1 = vcmask 130048  }
  0x49   :  { %828 = vmatprep.subr.bf16.mxu0 %v1083_v0  ;;  %830 = vmatprep.mubr.msk.bf16.mxu0 %vm1084_vm0, %v1083_v0  ;;  %v100_v2 = vld [vmem:[%s1354_s0] sm:$0xff]  ;;  %v944_v5 = vld [vmem:[%s1357_s3 + $0x8] sm:$0xff]   ;;  %v945_v6 = vld [vmem:[%s1357_s3 + $0x10] sm:$0xff]   ;;  %vm724_vm2 = vcmask 31744  }
  0x4a   :  { %834 = vmatprep.subr.bf16.mxu1 %v1083_v0  ;;  %850 = vmatprep.mubr.msk.bf16.mxu1 %vm1084_vm0, %v1083_v0  ;;  %v101_v3 = vpack.c.bf16 %v100_v2, %v100_v2  ;;  %v943_v4 = vld [vmem:[%s1357_s3] sm:$0xff]   ;;  %v946_v7 = vld [vmem:[%s1357_s3 + $0x18] sm:$0xff]   ;;  %v948_v9 = vld [vmem:[%s1357_s3 + $0x28] sm:$0xff]  }
  0x4b   :  { %829 = vmatpush3.bf16.msra.mxu0 %v942_v1  ;;  %835 = vmatpush3.bf16.msra.mxu1 %v943_v4  ;;  %v947_v8 = vld [vmem:[%s1357_s3 + $0x20] sm:$0xff]   ;;  %v949_v10 = vld [vmem:[%s1357_s3 + $0x30] sm:$0xff]   ;;  %v950_v11 = vld [vmem:[%s1357_s3 + $0x38] sm:$0xff]  }
  0x4c   :  { %854 = vmatprep.subr.bf16.mxu0 %v1083_v0  ;;  %836 = vmatprep.subr.bf16.mxu1 %v1083_v0  ;;  %v951_v12 = vld [vmem:[#allocation4] sm:$0xff]   ;;  %v952_v13 = vld [vmem:[#allocation4 + $0x8] sm:$0xff]   ;;  %v953_v14 = vld [vmem:[#allocation4 + $0x10] sm:$0xff]  }
  0x4d   :  { %v954_v15 = vld [vmem:[#allocation4 + $0x18] sm:$0xff]   ;;  %v955_v16 = vld [vmem:[#allocation4 + $0x20] sm:$0xff]   ;;  %v956_v17 = vld [vmem:[#allocation4 + $0x28] sm:$0xff]  }
  0x4e   :  { %831 = vmatmul.mubr.msk.bf16.vlgmr.msra.gmra.mrb[0].mxu0 %vm117_vm1, %v101_v3  ;;  %v733_v18 = vld [vmem:[%s1356_s2] ss:$0 sm:$0xff]  ;;  %v957_v25 = vld [vmem:[#allocation4 + $0x30] sm:$0xff]   ;;  %v959_v27 = vld [vmem:[#allocation6] sm:$0xff]  }
  0x4f   :  { %870 = vmatprep.mubr.msk.bf16.mxu0 %vm1084_vm0, %v1083_v0  ;;  %837 = vmatpush3.bf16.msra.mxu1 %v944_v5  ;;  %v958_v26 = vld [vmem:[#allocation4 + $0x38] sm:$0xff]   ;;  %v960_v28 = vld [vmem:[#allocation6 + $0x8] sm:$0xff]   ;;  %v961_v29 = vld [vmem:[#allocation6 + $0x10] sm:$0xff]  }
  0x50   :  { %838 = vmatprep.subr.bf16.mxu1 %v1083_v0  ;;  %855 = vmatpush3.bf16.msra.mxu0 %v951_v12  ;;  %v962_v30 = vld [vmem:[#allocation6 + $0x18] sm:$0xff]   ;;  %v963_v31 = vld [vmem:[#allocation6 + $0x20] sm:$0xff]   ;;  %v964_v32 = vld [vmem:[#allocation6 + $0x28] sm:$0xff]  }
  0x51   :  { %856 = vmatprep.subr.bf16.mxu0 %v1083_v0  ;;  %v736_v33 = vld [vmem:[%s1358_s4] ss:$0 sm:$0xff]  ;;  %v965_v41 = vld [vmem:[#allocation6 + $0x30] sm:$0xff]   ;;  %v967_v43 = vld [vmem:[#allocation7] sm:$0xff]  }
  0x52   :  { %v966_v42 = vld [vmem:[#allocation6 + $0x38] sm:$0xff]   ;;  %v968_v44 = vld [vmem:[#allocation7 + $0x8] sm:$0xff]   ;;  %v969_v45 = vld [vmem:[#allocation7 + $0x10] sm:$0xff]  }
  0x53   :  { %839 = vmatpush3.bf16.msra.mxu1 %v945_v6  ;;  %v970_v46 = vld [vmem:[#allocation7 + $0x18] sm:$0xff]   ;;  %v971_v47 = vld [vmem:[#allocation7 + $0x20] sm:$0xff]   ;;  %v972_v48 = vld [vmem:[#allocation7 + $0x28] sm:$0xff]  }
  0x54   :  { %840 = vmatprep.subr.bf16.mxu1 %v1083_v0  ;;  %857 = vmatpush3.bf16.msra.mxu0 %v952_v13  ;;  %v745_v49 = vld [vmem:[%s1360_s6] ss:$0 sm:$0xff]  ;;  %v973_v57 = vld [vmem:[#allocation7 + $0x30] sm:$0xff]   ;;  %v976_v60 = vld [vmem:[%s1365_s11 + $0x8] sm:$0xff]  }
  0x55   :  { %858 = vmatprep.subr.bf16.mxu0 %v1083_v0  ;;  %v974_v58 = vld [vmem:[#allocation7 + $0x38] sm:$0xff]   ;;  %v977_v61 = vld [vmem:[%s1365_s11 + $0x10] sm:$0xff]   ;;  %v978_v62 = vld [vmem:[%s1365_s11 + $0x18] sm:$0xff]  }
  0x56   :  { %v975_v59 = vld [vmem:[%s1365_s11] sm:$0xff]   ;;  %v980_v1 = vld [vmem:[%s1365_s11 + $0x28] sm:$0xff]   ;;  %v981_v2 = vld [vmem:[%s1365_s11 + $0x30] sm:$0xff]  }
  0x57   :  { %841 = vmatpush3.bf16.msra.mxu1 %v946_v7  ;;  %v979_v63 = vld [vmem:[%s1365_s11 + $0x20] sm:$0xff]  }
  0x58   :  { %842 = vmatprep.subr.bf16.mxu1 %v1083_v0  ;;  %859 = vmatpush3.bf16.msra.mxu0 %v953_v14  ;;  %v754_v3 = vld [vmem:[%s1362_s8] ss:$0 sm:$0xff] }
  0x59   :  { %860 = vmatprep.subr.bf16.mxu0 %v1083_v0 }
  0x5b   :  { %843 = vmatpush3.bf16.msra.mxu1 %v947_v8 }
  0x5c   :  { %844 = vmatprep.subr.bf16.mxu1 %v1083_v0  ;;  %861 = vmatpush3.bf16.msra.mxu0 %v954_v15 }
  0x5d   :  { %862 = vmatprep.subr.bf16.mxu0 %v1083_v0 }
  0x5f   :  { %845 = vmatpush3.bf16.msra.mxu1 %v948_v9 }
  0x60   :  { %846 = vmatprep.subr.bf16.mxu1 %v1083_v0  ;;  %863 = vmatpush3.bf16.msra.mxu0 %v955_v16 }
  0x61   :  { %864 = vmatprep.subr.bf16.mxu0 %v1083_v0 }
  0x63   :  { %847 = vmatpush3.bf16.msra.mxu1 %v949_v10 }
  0x64   :  { %848 = vmatprep.subr.bf16.mxu1 %v1083_v0  ;;  %865 = vmatpush3.bf16.msra.mxu0 %v956_v17 }
  0x65   :  { %866 = vmatprep.subr.bf16.mxu0 %v1083_v0 }
  0x67   :  { %849 = vmatpush3.bf16.msra.mxu1 %v950_v11  ;;  %v982_v11 = vld [vmem:[%s1365_s11 + $0x38] sm:$0xff]  }
  0x68   :  { %874 = vmatprep.subr.bf16.mxu1 %v1083_v0  ;;  %867 = vmatpush3.bf16.msra.mxu0 %v957_v25 }
  0x69   :  { %868 = vmatprep.subr.bf16.mxu0 %v1083_v0 }
  0x6c   :  { %869 = vmatpush3.bf16.msra.mxu0 %v958_v26 }
  0x6d   :  { %894 = vmatprep.subr.bf16.mxu0 %v1083_v0 }
 0x121   :  { %v155_v19 = vpop.f32.mrb[0].mxu0 }
 0x122   :  { %v156_v20 = vadd.f32 %v733_v18, %v155_v19  ;;  %v832_v21 = vpop.f32.mrb[1].mxu0  ;;  %v772_v18 = vld [vmem:[%s1366_s12] ss:$0 sm:$0xff] }
 0x123   :  { %v158_v22 = vpop.f32.mrb[2].mxu0 }
 0x124   :  { %v161_v23 = vpack.c.bf16 %v156_v20, %v156_v20  ;;  %v833_v24 = vpop.f32.mrb[3].mxu0 }
 0x126   :  { %851 = vmatmul.mubr.bf16.vlgmr.msra.gmra.mrb[0].mxu1 %v161_v23 }
 0x127   :  { %890 = vmatprep.mubr.msk.bf16.mxu1 %vm1084_vm0, %v1083_v0  ;;  %875 = vmatpush3.bf16.msra.mxu1 %v959_v27 }
 0x128   :  { %876 = vmatprep.subr.bf16.mxu1 %v1083_v0 }
 0x12b   :  { %877 = vmatpush3.bf16.msra.mxu1 %v960_v28 }
 0x12c   :  { %878 = vmatprep.subr.bf16.mxu1 %v1083_v0 }
 0x12f   :  { %879 = vmatpush3.bf16.msra.mxu1 %v961_v29 }
 0x130   :  { %880 = vmatprep.subr.bf16.mxu1 %v1083_v0 }
 0x133   :  { %881 = vmatpush3.bf16.msra.mxu1 %v962_v30 }
 0x134   :  { %882 = vmatprep.subr.bf16.mxu1 %v1083_v0 }
 0x137   :  { %883 = vmatpush3.bf16.msra.mxu1 %v963_v31 }
 0x138   :  { %884 = vmatprep.subr.bf16.mxu1 %v1083_v0 }
 0x13b   :  { %885 = vmatpush3.bf16.msra.mxu1 %v964_v32 }
 0x13c   :  { %886 = vmatprep.subr.bf16.mxu1 %v1083_v0 }
 0x13f   :  { %887 = vmatpush3.bf16.msra.mxu1 %v965_v41 }
 0x140   :  { %888 = vmatprep.subr.bf16.mxu1 %v1083_v0 }
 0x143   :  { %889 = vmatpush3.bf16.msra.mxu1 %v966_v42 }
 0x144   :  { %914 = vmatprep.subr.bf16.mxu1 %v1083_v0 }
 0x1f9   :  { %v267_v34 = vpop.f32.mrb[0].mxu1 }
 0x1fa   :  { %v268_v35 = vadd.f32 %v736_v33, %v267_v34  ;;  %v852_v36 = vpop.f32.mrb[1].mxu1 }
 0x1fb   :  { %v270_v37 = vpop.f32.mrb[2].mxu1 }
 0x1fc   :  { %v273_v38 = vmax.f32 %v268_v35, 0.0  ;;  %v853_v39 = vpop.f32.mrb[3].mxu1 }
 0x1fe   :  { %v274_v40 = vpack.c.bf16 %v273_v38, %v273_v38 }
 0x200   :  { %871 = vmatmul.mubr.bf16.vlgmr.msra.gmra.mrb[4].mxu0 %v274_v40 }
 0x201   :  { %910 = vmatprep.mubr.msk.bf16.mxu0 %vm1084_vm0, %v1083_v0  ;;  %895 = vmatpush3.bf16.msra.mxu0 %v967_v43 }
 0x202   :  { %896 = vmatprep.subr.bf16.mxu0 %v1083_v0 }
 0x205   :  { %897 = vmatpush3.bf16.msra.mxu0 %v968_v44 }
 0x206   :  { %898 = vmatprep.subr.bf16.mxu0 %v1083_v0 }
 0x209   :  { %899 = vmatpush3.bf16.msra.mxu0 %v969_v45 }
 0x20a   :  { %900 = vmatprep.subr.bf16.mxu0 %v1083_v0 }
 0x20d   :  { %901 = vmatpush3.bf16.msra.mxu0 %v970_v46 }
 0x20e   :  { %902 = vmatprep.subr.bf16.mxu0 %v1083_v0 }
 0x211   :  { %903 = vmatpush3.bf16.msra.mxu0 %v971_v47 }
 0x212   :  { %904 = vmatprep.subr.bf16.mxu0 %v1083_v0 }
 0x215   :  { %905 = vmatpush3.bf16.msra.mxu0 %v972_v48 }
 0x216   :  { %906 = vmatprep.subr.bf16.mxu0 %v1083_v0 }
 0x219   :  { %907 = vmatpush3.bf16.msra.mxu0 %v973_v57 }
 0x21a   :  { %908 = vmatprep.subr.bf16.mxu0 %v1083_v0 }
 0x21d   :  { %909 = vmatpush3.bf16.msra.mxu0 %v974_v58 }
 0x2d3   :  { %v380_v50 = vpop.f32.mrb[4].mxu0 }
 0x2d4   :  { %v381_v51 = vadd.f32 %v745_v49, %v380_v50  ;;  %v872_v52 = vpop.f32.mrb[5].mxu0 }
 0x2d5   :  { %v383_v53 = vpop.f32.mrb[6].mxu0 }
 0x2d6   :  { %v386_v54 = vmax.f32 %v381_v51, 0.0  ;;  %v873_v55 = vpop.f32.mrb[7].mxu0 }
 0x2d8   :  { %v387_v56 = vpack.c.bf16 %v386_v54, %v386_v54 }
 0x2da   :  { %891 = vmatmul.mubr.bf16.vlgmr.msra.gmra.mrb[4].mxu1 %v387_v56 }
 0x2db   :  { %930 = vmatprep.mubr.msk.bf16.mxu1 %vm1084_vm0, %v1083_v0  ;;  %915 = vmatpush3.bf16.msra.mxu1 %v975_v59 }
 0x2dc   :  { %916 = vmatprep.subr.bf16.mxu1 %v1083_v0 }
 0x2df   :  { %917 = vmatpush3.bf16.msra.mxu1 %v976_v60 }
 0x2e0   :  { %918 = vmatprep.subr.bf16.mxu1 %v1083_v0 }
 0x2e3   :  { %919 = vmatpush3.bf16.msra.mxu1 %v977_v61 }
 0x2e4   :  { %920 = vmatprep.subr.bf16.mxu1 %v1083_v0 }
 0x2e7   :  { %921 = vmatpush3.bf16.msra.mxu1 %v978_v62 }
 0x2e8   :  { %922 = vmatprep.subr.bf16.mxu1 %v1083_v0 }
 0x2eb   :  { %923 = vmatpush3.bf16.msra.mxu1 %v979_v63 }
 0x2ec   :  { %924 = vmatprep.subr.bf16.mxu1 %v1083_v0 }
 0x2ef   :  { %925 = vmatpush3.bf16.msra.mxu1 %v980_v1 }
 0x2f0   :  { %926 = vmatprep.subr.bf16.mxu1 %v1083_v0 }
 0x2f3   :  { %927 = vmatpush3.bf16.msra.mxu1 %v981_v2 }
 0x2f4   :  { %928 = vmatprep.subr.bf16.mxu1 %v1083_v0  ;;  %v763_v0 = vld [vmem:[%s1364_s10] ss:$0 sm:$0xff] }
 0x2f7   :  { %929 = vmatpush3.bf16.msra.mxu1 %v982_v11 }
 0x3ad   :  { %v493_v4 = vpop.f32.mrb[4].mxu1 }
 0x3ae   :  { %v494_v5 = vadd.f32 %v754_v3, %v493_v4  ;;  %v892_v6 = vpop.f32.mrb[5].mxu1 }
 0x3af   :  { %v496_v7 = vpop.f32.mrb[6].mxu1 }
 0x3b0   :  { %v499_v8 = vmax.f32 %v494_v5, 0.0  ;;  %v893_v9 = vpop.f32.mrb[7].mxu1 }
 0x3b2   :  { %v500_v10 = vpack.c.bf16 %v499_v8, %v499_v8 }
 0x3b4   :  { %911 = vmatmul.mubr.bf16.vlgmr.msra.gmra.mrb[8].mxu0 %v500_v10 }
 0x487   :  { %v606_v12 = vpop.f32.mrb[8].mxu0 }
 0x488   :  { %v607_v13 = vadd.f32 %v763_v0, %v606_v12  ;;  %v912_v14 = vpop.f32.mrb[9].mxu0 }
 0x489   :  { %v609_v15 = vpop.f32.mrb[10].mxu0 }
 0x48a   :  { %v612_v16 = vpack.c.bf16 %v607_v13, %v607_v13  ;;  %v913_v17 = vpop.f32.mrb[11].mxu0 }
 0x48c   :  { %931 = vmatmul.mubr.bf16.vlgmr.msra.gmra.mrb[8].mxu1 %v612_v16 }
 0x55f   :  { %v718_v19 = vpop.f32.mrb[8].mxu1 }
 0x560   :  { %v719_v20 = vadd.f32 %v772_v18, %v718_v19  ;;  %v932_v21 = vpop.f32.mrb[9].mxu1 }
 0x561   :  { %v721_v22 = vpop.f32.mrb[10].mxu1 }
 0x562   :  { %725 = vst.msk [vmem:[%s1367_s13] sm:$0xff] %vm724_vm2, %v719_v20  ;;  %v933_v23 = vpop.f32.mrb[11].mxu1 }
 0x563   :  { %730 = vsyncpa [#allocation3], 1 }
 0x564   :  { %731 = vsyncpa [#allocation5], 1 }
 0x565   :  { %732 = vsyncpa [#allocation8], 1 }

</bundles_post_ra>
